<compile_context>
chip_gen: v6e
topology: v6e:2x2x1
jax: 0.10.0
libtpu: 0.0.40
codegen_flags: <defaults>
</compile_context>

<pallas_src>
import math

import jax
import jax.numpy as jnp
from jax.experimental import pallas as pl
from jax.experimental.pallas import tpu as pltpu

# ----------------------------- config (T5Config fields used by the module) ---
D_MODEL = 32
D_KV = 8
NUM_HEADS = 4
INNER_DIM = NUM_HEADS * D_KV
BLOCK_LEN = 8          # config.sliding_window
N_GLOBAL = 4           # config.global_block_size
NUM_BUCKETS = 32       # config.relative_attention_num_buckets
MAX_DISTANCE = 128     # config.relative_attention_max_distance
IS_DECODER = False     # config.is_decoder

NEG_BIG = -1e10
_VMEM_LIMIT = 32 * 1024 * 1024   # fits every generation (v7x physical VMEM is 64 MiB)


# ----------------------------- fused attention kernel -------------------------
def _fused_attn_kernel(x_ref, wq_ref, wk_ref, wv_ref, bg_ref, bl_ref, sb_ref,
                       mg_ref, ml_ref, wo_ref, o_ref, side_acc):
    # x     : (1, Sp, D)   padded hidden states of this batch element (resident per b)
    # wq/wk/wv : (1, D, dk) per-head projection weight slices
    # bg    : (1, L, G)    block position-bias columns for the prepended global keys
    # bl    : (1, L, L)    block position-bias columns for the local keys
    # sb    : (1, G, Sp)   side position bias (padded key columns pre-set to -1e10)
    # mg/ml : (1, nb, G/L) additive attention mask columns (reference column-order quirk)
    # wo    : (1, dk, D)   per-head output-projection slice
    # o     : (1, Sp, D)   output block, accumulated over the head grid axis
    # side_acc : (G, D)    VMEM scratch accumulating the o-projected side attention
    h = pl.program_id(1)

    x = x_ref[0]            # (Sp, D)
    wq = wq_ref[0]          # (D, dk)
    wk = wk_ref[0]
    wv = wv_ref[0]
    wo = wo_ref[0]          # (dk, D)
    bias_g = bg_ref[0]      # (L, G)
    bias_l = bl_ref[0]      # (L, L)
    sbias = sb_ref[0]       # (G, Sp)
    mask_g = mg_ref[0]      # (nb, G)
    mask_l = ml_ref[0]      # (nb, L)

    Sp = x.shape[0]
    dk = wq.shape[-1]
    L = bias_l.shape[-1]
    G = bias_g.shape[-1]
    nb = Sp // L

    # ---- per-head q/k/v projection (nn.Linear, bias=False; zero rows stay zero) --
    q = jnp.dot(x, wq, preferred_element_type=jnp.float32)   # (Sp, dk)
    k = jnp.dot(x, wk, preferred_element_type=jnp.float32)
    v = jnp.dot(x, wv, preferred_element_type=jnp.float32)

    qg = q[:G, :]     # (G, dk)  side queries
    kg = k[:G, :]     # (G, dk)  global keys prepended to every block
    vg = v[:G, :]

    qb = q.reshape(nb, L, dk)
    kb = k.reshape(nb, L, dk)
    vb = v.reshape(nb, L, dk)

    # ---- blocked attention: per block, keys = [global(G) | local(L)] -------------
    s_glb = jnp.einsum('sd,gd->sg', q, kg,
                       preferred_element_type=jnp.float32).reshape(nb, L, G)
    s_loc = jnp.einsum('nqd,nkd->nqk', qb, kb, preferred_element_type=jnp.float32)
    s_glb = s_glb + bias_g[None] + mask_g[:, None, :]
    s_loc = s_loc + bias_l[None] + mask_l[:, None, :]

    m = jnp.maximum(jnp.max(s_glb, axis=-1, keepdims=True),
                    jnp.max(s_loc, axis=-1, keepdims=True))               # (nb, L, 1)
    e_glb = jnp.exp(s_glb - m)
    e_loc = jnp.exp(s_loc - m)
    denom = jnp.sum(e_glb, axis=-1, keepdims=True) + jnp.sum(e_loc, axis=-1, keepdims=True)
    ctx_g = jnp.dot(e_glb.reshape(Sp, G), vg,
                    preferred_element_type=jnp.float32).reshape(nb, L, dk)
    ctx_l = jnp.einsum('nqk,nkd->nqd', e_loc, vb, preferred_element_type=jnp.float32)
    o_blk = (ctx_g + ctx_l) / denom                                       # (nb, L, dk)

    # ---- side (global-token) attention over the full sequence of this head -------
    s_sd = jnp.einsum('gd,sd->gs', qg, k, preferred_element_type=jnp.float32) + sbias
    e_sd = jnp.exp(s_sd - jnp.max(s_sd, axis=-1, keepdims=True))
    o_sd = (jnp.dot(e_sd, v, preferred_element_type=jnp.float32)
            / jnp.sum(e_sd, axis=-1, keepdims=True))                      # (G, dk)

    # ---- fused output projection, accumulated over the head (reduction) axis -----
    proj_blk = jnp.dot(o_blk.reshape(Sp, dk), wo, preferred_element_type=jnp.float32)  # (Sp, D)
    proj_sd = jnp.dot(o_sd, wo, preferred_element_type=jnp.float32)                    # (G, D)

    @pl.when(h == 0)
    def _():
        o_ref[...] = jnp.zeros_like(o_ref)
        side_acc[...] = jnp.zeros_like(side_acc)

    o_ref[0] = o_ref[0] + proj_blk
    side_acc[...] = side_acc[...] + proj_sd

    @pl.when(h == pl.num_programs(1) - 1)
    def _():
        # reference: attn_output[:, :n_global_tokens, :] is overwritten with the
        # side-attention result before the o-projection; fold into the final store.
        o_ref[0, :G, :] = side_acc[...]


def fused_attention_pallas(x, wq3, wk3, wv3, bias_g, bias_l, side_bias,
                           mask_g, mask_l, wo3):
    B, Sp, D = x.shape
    H, _, dk = wq3.shape
    L = bias_l.shape[-1]
    G = bias_g.shape[-1]
    nb = Sp // L
    return pl.pallas_call(
        _fused_attn_kernel,
        out_shape=jax.ShapeDtypeStruct((B, Sp, D), jnp.float32),
        grid=(B, H),
        in_specs=[
            pl.BlockSpec((1, Sp, D), lambda b, h: (b, 0, 0)),    # hidden states (resident per b)
            pl.BlockSpec((1, D, dk), lambda b, h: (h, 0, 0)),    # Wq head slice
            pl.BlockSpec((1, D, dk), lambda b, h: (h, 0, 0)),    # Wk head slice
            pl.BlockSpec((1, D, dk), lambda b, h: (h, 0, 0)),    # Wv head slice
            pl.BlockSpec((1, L, G), lambda b, h: (h, 0, 0)),     # block bias, global-key columns
            pl.BlockSpec((1, L, L), lambda b, h: (h, 0, 0)),     # block bias, local-key columns
            pl.BlockSpec((1, G, Sp), lambda b, h: (h, 0, 0)),    # side bias (padded keys = -1e10)
            pl.BlockSpec((1, nb, G), lambda b, h: (b, 0, 0)),    # additive mask, global-key cols
            pl.BlockSpec((1, nb, L), lambda b, h: (b, 0, 0)),    # additive mask, local-key cols
            pl.BlockSpec((1, dk, D), lambda b, h: (h, 0, 0)),    # Wo head slice
        ],
        out_specs=pl.BlockSpec((1, Sp, D), lambda b, h: (b, 0, 0)),
        scratch_shapes=[pltpu.VMEM((G, D), jnp.float32)],
        compiler_params=pltpu.CompilerParams(
            dimension_semantics=("parallel", "arbitrary"),
            vmem_limit_bytes=_VMEM_LIMIT,
        ),
    )(x, wq3, wk3, wv3, bias_g, bias_l, side_bias, mask_g, mask_l, wo3)


# ----------------------------- relative position bias (glue, tiny) ------------
def _relative_position_bucket(relative_position, bidirectional, num_buckets, max_distance):
    relative_buckets = jnp.zeros_like(relative_position)
    if bidirectional:
        num_buckets //= 2
        relative_buckets = relative_buckets + (relative_position > 0).astype(jnp.int32) * num_buckets
        relative_position = jnp.abs(relative_position)
    else:
        relative_position = -jnp.minimum(relative_position, jnp.zeros_like(relative_position))
    max_exact = num_buckets // 2
    is_small = relative_position < max_exact
    rel_f = jnp.maximum(relative_position, 1).astype(jnp.float32)  # avoid log(0); discarded by where
    rel_if_large = max_exact + (
        jnp.log(rel_f / max_exact) / math.log(max_distance / max_exact) * (num_buckets - max_exact)
    ).astype(jnp.int32)
    rel_if_large = jnp.minimum(rel_if_large, num_buckets - 1)
    relative_buckets = relative_buckets + jnp.where(is_small, relative_position, rel_if_large)
    return relative_buckets


def compute_bias(rel_emb, query_length, key_length, side_length=0):
    """T5BlockAttention.compute_bias — returns (1, H, query_length, key_length)."""
    side_position = jnp.arange(side_length, dtype=jnp.int32)
    context_position = jnp.arange(side_length, query_length + side_length, dtype=jnp.int32)[:, None]
    memory_position = jnp.arange(side_length, key_length, dtype=jnp.int32)
    memory_position = jnp.concatenate([memory_position, side_position])[None, :]
    relative_position = memory_position - context_position
    buckets = _relative_position_bucket(
        relative_position, bidirectional=not IS_DECODER,
        num_buckets=NUM_BUCKETS, max_distance=MAX_DISTANCE)
    values = rel_emb[buckets]                       # (q, k, H)
    return jnp.transpose(values, (2, 0, 1))[None]   # (1, H, q, k)


# ----------------------------- full forward -----------------------------------
def t5_block_attention_forward(params, hidden_states, mask=None):
    B, S, D = hidden_states.shape
    H, dk, L, G = NUM_HEADS, D_KV, BLOCK_LEN, N_GLOBAL

    full_blocks = (S // L) >= 1
    assert full_blocks, "only the full_blocks path is implemented"
    assert G <= L, "global_block_size must fit inside one block for this kernel"
    # TODO(synk): the `not full_blocks` branch (seq shorter than one block) is not implemented.

    pad = (-S) % L
    S_pad = S + pad
    nb = S_pad // L
    key_target_length = S_pad + G
    block_len_b = L + G

    # zero-pad hidden states; projected zero rows == reference's zero-padded blocked k/v
    x = jnp.pad(hidden_states.astype(jnp.float32), ((0, 0), (0, pad), (0, 0)))  # (B, Sp, D)

    # ---- relative position bias (has_relative_attention_bias=True) -----------
    position_bias = compute_bias(params["rel_emb"], block_len_b, key_target_length)  # (1,H,L+G,Kt)
    block_bias = position_bias[0, :, G:, :L + G]                 # (H, L, L+G), shared by all blocks
    bias_g = block_bias[:, :, :G]                                # columns for the global keys
    bias_l = block_bias[:, :, G:]                                # columns for the local keys
    side_bias = position_bias[0, :, :G, :S]                      # (H, G, S)
    # keys introduced by zero-padding get -1e10 so they contribute exactly 0 (== reference's S keys)
    side_bias = jnp.pad(side_bias, ((0, 0), (0, 0), (0, pad)), constant_values=NEG_BIG)

    # ---- additive attention mask (reference parity, incl. [local, side] order quirk) ----
    if mask is not None:
        ext = (1.0 - mask.astype(jnp.float32)) * NEG_BIG         # extended mask (B, S)
        ext = jnp.pad(ext, ((0, 0), (0, pad)))                   # zero-pad (as _split_into_blocks)
        local_m = ext.reshape(B, nb, L)
        side_m = jnp.zeros((B, nb, G), jnp.float32).at[:, 0, :].set(NEG_BIG)
        # NOTE: reference concatenates mask columns as [local, side] while the keys are ordered
        # [global, local]; reproduce the resulting column alignment verbatim.
        mask_g = local_m[..., :G]                                # applied to the global-key columns
        mask_l = jnp.concatenate([local_m[..., G:], side_m], axis=-1)   # applied to the local keys
    else:
        mask_g = jnp.zeros((B, nb, G), jnp.float32)
        mask_l = jnp.zeros((B, nb, L), jnp.float32)

    out = fused_attention_pallas(x, params["wq3"], params["wk3"], params["wv3"],
                                 bias_g, bias_l, side_bias, mask_g, mask_l,
                                 params["wo3"])                  # (B, Sp, D), already o-projected
    attn_output = out[:, :S, :]
    return attn_output, position_bias


# ----------------------------- driver -----------------------------------------
def init_params(key):
    k1, k2, k3, k4, k5 = jax.random.split(key, 5)
    scale = 0.05
    wq = scale * jax.random.normal(k1, (INNER_DIM, D_MODEL), jnp.float32)
    wk = scale * jax.random.normal(k2, (INNER_DIM, D_MODEL), jnp.float32)
    wv = scale * jax.random.normal(k3, (INNER_DIM, D_MODEL), jnp.float32)
    wo = scale * jax.random.normal(k4, (D_MODEL, INNER_DIM), jnp.float32)
    rel_emb = scale * jax.random.normal(k5, (NUM_BUCKETS, NUM_HEADS), jnp.float32)
    # per-head, pre-transposed layouts built once outside the jitted forward
    return {
        "wq3": wq.reshape(NUM_HEADS, D_KV, D_MODEL).transpose(0, 2, 1),   # (H, D, dk)
        "wk3": wk.reshape(NUM_HEADS, D_KV, D_MODEL).transpose(0, 2, 1),
        "wv3": wv.reshape(NUM_HEADS, D_KV, D_MODEL).transpose(0, 2, 1),
        "wo3": wo.T.reshape(NUM_HEADS, D_KV, D_MODEL),                    # (H, dk, D)
        "rel_emb": rel_emb,
    }


if __name__ == "__main__":
    key = jax.random.PRNGKey(0)
    kp, kh = jax.random.split(key)
    params = init_params(kp)

    B, S = 2, 20
    hidden_states = jax.random.normal(kh, (B, S, D_MODEL), jnp.float32)
    mask = jnp.ones((B, S), jnp.float32).at[1, 17:].set(0.0)  # last 3 tokens of batch 1 masked

    fwd = jax.jit(t5_block_attention_forward)
    attn_output, position_bias = fwd(params, hidden_states, mask)
    jax.block_until_ready(attn_output)

    S_pad = S + (-S) % BLOCK_LEN
    assert attn_output.shape == (B, S, D_MODEL)
    assert position_bias.shape == (1, NUM_HEADS, BLOCK_LEN + N_GLOBAL, S_pad + N_GLOBAL)
    assert bool(jnp.all(jnp.isfinite(attn_output)))
    print("KERNEL_OK")
</pallas_src>

<mosaic_0001>
module attributes {stable_mosaic.version = 11 : i64} {
  func.func @_fused_attn_kernel(%arg0: i32, %arg1: i32, %arg2: memref<1x24x32xf32, #tpu.memory_space<vmem>>, %arg3: memref<1x32x8xf32, #tpu.memory_space<vmem>>, %arg4: memref<1x32x8xf32, #tpu.memory_space<vmem>>, %arg5: memref<1x32x8xf32, #tpu.memory_space<vmem>>, %arg6: memref<1x8x4xf32, #tpu.memory_space<vmem>>, %arg7: memref<1x8x8xf32, #tpu.memory_space<vmem>>, %arg8: memref<1x4x24xf32, #tpu.memory_space<vmem>>, %arg9: memref<1x3x4xf32, #tpu.memory_space<vmem>>, %arg10: memref<1x3x8xf32, #tpu.memory_space<vmem>>, %arg11: memref<1x8x32xf32, #tpu.memory_space<vmem>>, %arg12: memref<1x24x32xf32, #tpu.memory_space<vmem>>, %arg13: memref<4x32xf32, #tpu.memory_space<vmem>>) attributes {dimension_semantics = [#tpu.dimension_semantics<parallel>, #tpu.dimension_semantics<arbitrary>], iteration_bounds = array<i64: 2, 4>, scalar_prefetch = 0 : i64, scratch_operands = 1 : i64, tpu.core_type = #tpu.core_type<tc>, window_params = [{transform_indices = @transform_0, window_bounds = array<i64: 1, 24, 32>}, {transform_indices = @transform_1, window_bounds = array<i64: 1, 32, 8>}, {transform_indices = @transform_2, window_bounds = array<i64: 1, 32, 8>}, {transform_indices = @transform_3, window_bounds = array<i64: 1, 32, 8>}, {transform_indices = @transform_4, window_bounds = array<i64: 1, 8, 4>}, {transform_indices = @transform_5, window_bounds = array<i64: 1, 8, 8>}, {transform_indices = @transform_6, window_bounds = array<i64: 1, 4, 24>}, {transform_indices = @transform_7, window_bounds = array<i64: 1, 3, 4>}, {transform_indices = @transform_8, window_bounds = array<i64: 1, 3, 8>}, {transform_indices = @transform_9, window_bounds = array<i64: 1, 8, 32>}, {transform_indices = @transform_10, window_bounds = array<i64: 1, 24, 32>}]} {
    %c0 = arith.constant 0 : index
    %c0_0 = arith.constant 0 : index
    %c0_1 = arith.constant 0 : index
    %0 = vector.load %arg2[%c0, %c0_0, %c0_1] : memref<1x24x32xf32, #tpu.memory_space<vmem>>, vector<1x24x32xf32>
    %1 = vector.shape_cast %0 : vector<1x24x32xf32> to vector<24x32xf32>
    %c0_2 = arith.constant 0 : index
    %c0_3 = arith.constant 0 : index
    %c0_4 = arith.constant 0 : index
    %2 = vector.load %arg3[%c0_2, %c0_3, %c0_4] : memref<1x32x8xf32, #tpu.memory_space<vmem>>, vector<1x32x8xf32>
    %3 = vector.shape_cast %2 : vector<1x32x8xf32> to vector<32x8xf32>
    %c0_5 = arith.constant 0 : index
    %c0_6 = arith.constant 0 : index
    %c0_7 = arith.constant 0 : index
    %4 = vector.load %arg4[%c0_5, %c0_6, %c0_7] : memref<1x32x8xf32, #tpu.memory_space<vmem>>, vector<1x32x8xf32>
    %5 = vector.shape_cast %4 : vector<1x32x8xf32> to vector<32x8xf32>
    %c0_8 = arith.constant 0 : index
    %c0_9 = arith.constant 0 : index
    %c0_10 = arith.constant 0 : index
    %6 = vector.load %arg5[%c0_8, %c0_9, %c0_10] : memref<1x32x8xf32, #tpu.memory_space<vmem>>, vector<1x32x8xf32>
    %7 = vector.shape_cast %6 : vector<1x32x8xf32> to vector<32x8xf32>
    %c0_11 = arith.constant 0 : index
    %c0_12 = arith.constant 0 : index
    %c0_13 = arith.constant 0 : index
    %8 = vector.load %arg11[%c0_11, %c0_12, %c0_13] : memref<1x8x32xf32, #tpu.memory_space<vmem>>, vector<1x8x32xf32>
    %9 = vector.shape_cast %8 : vector<1x8x32xf32> to vector<8x32xf32>
    %c0_14 = arith.constant 0 : index
    %c0_15 = arith.constant 0 : index
    %c0_16 = arith.constant 0 : index
    %10 = vector.load %arg6[%c0_14, %c0_15, %c0_16] : memref<1x8x4xf32, #tpu.memory_space<vmem>>, vector<1x8x4xf32>
    %11 = vector.shape_cast %10 : vector<1x8x4xf32> to vector<8x4xf32>
    %c0_17 = arith.constant 0 : index
    %c0_18 = arith.constant 0 : index
    %c0_19 = arith.constant 0 : index
    %12 = vector.load %arg7[%c0_17, %c0_18, %c0_19] : memref<1x8x8xf32, #tpu.memory_space<vmem>>, vector<1x8x8xf32>
    %13 = vector.shape_cast %12 : vector<1x8x8xf32> to vector<8x8xf32>
    %c0_20 = arith.constant 0 : index
    %c0_21 = arith.constant 0 : index
    %c0_22 = arith.constant 0 : index
    %14 = vector.load %arg8[%c0_20, %c0_21, %c0_22] : memref<1x4x24xf32, #tpu.memory_space<vmem>>, vector<1x4x24xf32>
    %15 = vector.shape_cast %14 : vector<1x4x24xf32> to vector<4x24xf32>
    %c0_23 = arith.constant 0 : index
    %c0_24 = arith.constant 0 : index
    %c0_25 = arith.constant 0 : index
    %16 = vector.load %arg9[%c0_23, %c0_24, %c0_25] : memref<1x3x4xf32, #tpu.memory_space<vmem>>, vector<1x3x4xf32>
    %17 = vector.shape_cast %16 : vector<1x3x4xf32> to vector<3x4xf32>
    %c0_26 = arith.constant 0 : index
    %c0_27 = arith.constant 0 : index
    %c0_28 = arith.constant 0 : index
    %18 = vector.load %arg10[%c0_26, %c0_27, %c0_28] : memref<1x3x8xf32, #tpu.memory_space<vmem>>, vector<1x3x8xf32>
    %19 = vector.shape_cast %18 : vector<1x3x8xf32> to vector<3x8xf32>
    %cst = arith.constant dense<0.000000e+00> : vector<24x8xf32>
    %20 = tpu.matmul %1, %3, %cst {dimension_numbers = #tpu.dot_dimension_numbers<[1], [0], [0], [1], [0, 0, 1, 1], [], []>} : vector<24x32xf32>, vector<32x8xf32>, vector<24x8xf32> -> vector<24x8xf32>
    %cst_29 = arith.constant dense<0.000000e+00> : vector<24x8xf32>
    %21 = tpu.matmul %1, %5, %cst_29 {dimension_numbers = #tpu.dot_dimension_numbers<[1], [0], [0], [1], [0, 0, 1, 1], [], []>} : vector<24x32xf32>, vector<32x8xf32>, vector<24x8xf32> -> vector<24x8xf32>
    %cst_30 = arith.constant dense<0.000000e+00> : vector<24x8xf32>
    %22 = tpu.matmul %1, %7, %cst_30 {dimension_numbers = #tpu.dot_dimension_numbers<[1], [0], [0], [1], [0, 0, 1, 1], [], []>} : vector<24x32xf32>, vector<32x8xf32>, vector<24x8xf32> -> vector<24x8xf32>
    %23 = vector.extract_strided_slice %20 {offsets = [0, 0], sizes = [4, 8], strides = [1, 1]} : vector<24x8xf32> to vector<4x8xf32>
    %24 = vector.extract_strided_slice %21 {offsets = [0, 0], sizes = [4, 8], strides = [1, 1]} : vector<24x8xf32> to vector<4x8xf32>
    %25 = vector.extract_strided_slice %22 {offsets = [0, 0], sizes = [4, 8], strides = [1, 1]} : vector<24x8xf32> to vector<4x8xf32>
    %26 = vector.shape_cast %20 : vector<24x8xf32> to vector<3x8x8xf32>
    %27 = vector.shape_cast %21 : vector<24x8xf32> to vector<3x8x8xf32>
    %28 = vector.shape_cast %22 : vector<24x8xf32> to vector<3x8x8xf32>
    "tpu.trace_start"() <{level = 10 : i32, message = "sd,gd->sg"}> : () -> ()
    %cst_31 = arith.constant dense<0.000000e+00> : vector<24x4xf32>
    %29 = tpu.matmul %20, %24, %cst_31 {dimension_numbers = #tpu.dot_dimension_numbers<[1], [1], [0], [0], [0, 0, 1, 0], [], []>} : vector<24x8xf32>, vector<4x8xf32>, vector<24x4xf32> -> vector<24x4xf32>
    "tpu.trace_stop"() : () -> ()
    %30 = vector.shape_cast %29 : vector<24x4xf32> to vector<3x8x4xf32>
    "tpu.trace_start"() <{level = 10 : i32, message = "nqd,nkd->nqk"}> : () -> ()
    %cst_32 = arith.constant dense<0.000000e+00> : vector<3x8x8xf32>
    %31 = tpu.matmul %26, %27, %cst_32 {dimension_numbers = #tpu.dot_dimension_numbers<[2], [2], [1], [1], [0, 0, 0, 1, 1, 1], [0], [0]>} : vector<3x8x8xf32>, vector<3x8x8xf32>, vector<3x8x8xf32> -> vector<3x8x8xf32>
    "tpu.trace_stop"() : () -> ()
    %32 = vector.shape_cast %11 : vector<8x4xf32> to vector<1x8x4xf32>
    %33 = vector.broadcast %32 : vector<1x8x4xf32> to vector<3x8x4xf32>
    %34 = arith.addf %30, %33 : vector<3x8x4xf32>
    %35 = vector.shape_cast %17 : vector<3x4xf32> to vector<3x1x4xf32>
    %36 = vector.broadcast %35 : vector<3x1x4xf32> to vector<3x8x4xf32>
    %37 = arith.addf %34, %36 : vector<3x8x4xf32>
    %38 = vector.shape_cast %13 : vector<8x8xf32> to vector<1x8x8xf32>
    %39 = vector.broadcast %38 : vector<1x8x8xf32> to vector<3x8x8xf32>
    %40 = arith.addf %31, %39 : vector<3x8x8xf32>
    %41 = vector.shape_cast %19 : vector<3x8xf32> to vector<3x1x8xf32>
    %42 = vector.broadcast %41 : vector<3x1x8xf32> to vector<3x8x8xf32>
    %43 = arith.addf %40, %42 : vector<3x8x8xf32>
    %cst_33 = arith.constant dense<0xFF800000> : vector<3x8xf32>
    %44 = vector.multi_reduction <maximumf>, %37, %cst_33 [2] : vector<3x8x4xf32> to vector<3x8xf32>
    %45 = vector.shape_cast %44 : vector<3x8xf32> to vector<3x8x1xf32>
    %cst_34 = arith.constant dense<0xFF800000> : vector<3x8xf32>
    %46 = vector.multi_reduction <maximumf>, %43, %cst_34 [2] : vector<3x8x8xf32> to vector<3x8xf32>
    %47 = vector.shape_cast %46 : vector<3x8xf32> to vector<3x8x1xf32>
    %48 = arith.maximumf %45, %47 : vector<3x8x1xf32>
    %49 = vector.broadcast %48 : vector<3x8x1xf32> to vector<3x8x4xf32>
    %50 = arith.subf %37, %49 : vector<3x8x4xf32>
    %51 = math.exp %50 : vector<3x8x4xf32>
    %52 = vector.broadcast %48 : vector<3x8x1xf32> to vector<3x8x8xf32>
    %53 = arith.subf %43, %52 : vector<3x8x8xf32>
    %54 = math.exp %53 : vector<3x8x8xf32>
    %cst_35 = arith.constant dense<0.000000e+00> : vector<3x8xf32>
    %55 = vector.multi_reduction <add>, %51, %cst_35 [2] : vector<3x8x4xf32> to vector<3x8xf32>
    %56 = vector.shape_cast %55 : vector<3x8xf32> to vector<3x8x1xf32>
    %cst_36 = arith.constant dense<0.000000e+00> : vector<3x8xf32>
    %57 = vector.multi_reduction <add>, %54, %cst_36 [2] : vector<3x8x8xf32> to vector<3x8xf32>
    %58 = vector.shape_cast %57 : vector<3x8xf32> to vector<3x8x1xf32>
    %59 = arith.addf %56, %58 : vector<3x8x1xf32>
    %60 = vector.shape_cast %51 : vector<3x8x4xf32> to vector<24x4xf32>
    %cst_37 = arith.constant dense<0.000000e+00> : vector<24x8xf32>
    %61 = tpu.matmul %60, %25, %cst_37 {dimension_numbers = #tpu.dot_dimension_numbers<[1], [0], [0], [1], [0, 0, 1, 1], [], []>} : vector<24x4xf32>, vector<4x8xf32>, vector<24x8xf32> -> vector<24x8xf32>
    %62 = vector.shape_cast %61 : vector<24x8xf32> to vector<3x8x8xf32>
    "tpu.trace_start"() <{level = 10 : i32, message = "nqk,nkd->nqd"}> : () -> ()
    %cst_38 = arith.constant dense<0.000000e+00> : vector<3x8x8xf32>
    %63 = tpu.matmul %54, %28, %cst_38 {dimension_numbers = #tpu.dot_dimension_numbers<[2], [1], [1], [2], [0, 0, 0, 1, 1, 2], [0], [0]>} : vector<3x8x8xf32>, vector<3x8x8xf32>, vector<3x8x8xf32> -> vector<3x8x8xf32>
    "tpu.trace_stop"() : () -> ()
    %64 = arith.addf %62, %63 : vector<3x8x8xf32>
    %65 = vector.broadcast %59 : vector<3x8x1xf32> to vector<3x8x8xf32>
    %66 = arith.divf %64, %65 : vector<3x8x8xf32>
    "tpu.trace_start"() <{level = 10 : i32, message = "gd,sd->gs"}> : () -> ()
    %cst_39 = arith.constant dense<0.000000e+00> : vector<4x24xf32>
    %67 = tpu.matmul %23, %21, %cst_39 {dimension_numbers = #tpu.dot_dimension_numbers<[1], [1], [0], [0], [0, 0, 1, 0], [], []>} : vector<4x8xf32>, vector<24x8xf32>, vector<4x24xf32> -> vector<4x24xf32>
    "tpu.trace_stop"() : () -> ()
    %68 = arith.addf %67, %15 : vector<4x24xf32>
    %cst_40 = arith.constant dense<0xFF800000> : vector<4xf32>
    %69 = vector.multi_reduction <maximumf>, %68, %cst_40 [1] : vector<4x24xf32> to vector<4xf32>
    %70 = vector.shape_cast %69 : vector<4xf32> to vector<4x1xf32>
    %71 = vector.broadcast %70 : vector<4x1xf32> to vector<4x24xf32>
    %72 = arith.subf %68, %71 : vector<4x24xf32>
    %73 = math.exp %72 : vector<4x24xf32>
    %cst_41 = arith.constant dense<0.000000e+00> : vector<4x8xf32>
    %74 = tpu.matmul %73, %22, %cst_41 {dimension_numbers = #tpu.dot_dimension_numbers<[1], [0], [0], [1], [0, 0, 1, 1], [], []>} : vector<4x24xf32>, vector<24x8xf32>, vector<4x8xf32> -> vector<4x8xf32>
    %cst_42 = arith.constant dense<0.000000e+00> : vector<4xf32>
    %75 = vector.multi_reduction <add>, %73, %cst_42 [1] : vector<4x24xf32> to vector<4xf32>
    %76 = vector.shape_cast %75 : vector<4xf32> to vector<4x1xf32>
    %77 = vector.broadcast %76 : vector<4x1xf32> to vector<4x8xf32>
    %78 = arith.divf %74, %77 : vector<4x8xf32>
    %79 = vector.shape_cast %66 : vector<3x8x8xf32> to vector<24x8xf32>
    %cst_43 = arith.constant dense<0.000000e+00> : vector<24x32xf32>
    %80 = tpu.matmul %79, %9, %cst_43 {dimension_numbers = #tpu.dot_dimension_numbers<[1], [0], [0], [1], [0, 0, 1, 1], [], []>} : vector<24x8xf32>, vector<8x32xf32>, vector<24x32xf32> -> vector<24x32xf32>
    %cst_44 = arith.constant dense<0.000000e+00> : vector<4x32xf32>
    %81 = tpu.matmul %78, %9, %cst_44 {dimension_numbers = #tpu.dot_dimension_numbers<[1], [0], [0], [1], [0, 0, 1, 1], [], []>} : vector<4x8xf32>, vector<8x32xf32>, vector<4x32xf32> -> vector<4x32xf32>
    %c0_i32 = arith.constant 0 : i32
    %82 = arith.cmpi eq, %arg1, %c0_i32 : i32
    %83 = arith.extui %82 : i1 to i32
    %c0_i32_45 = arith.constant 0 : i32
    %84 = arith.cmpi ne, %83, %c0_i32_45 : i32
    scf.if %84 {
      %cst_57 = arith.constant 0.000000e+00 : f32
      %97 = vector.broadcast %cst_57 : f32 to vector<1x24x32xf32>
      %c0_58 = arith.constant 0 : index
      %c0_59 = arith.constant 0 : index
      %c0_60 = arith.constant 0 : index
      %98 = vector.load %arg12[%c0_58, %c0_59, %c0_60] : memref<1x24x32xf32, #tpu.memory_space<vmem>>, vector<1x24x32xf32>
      tpu.vector_store %arg12[%c0_58, %c0_59, %c0_60], %97 {strides = array<i32>} : memref<1x24x32xf32, #tpu.memory_space<vmem>>, vector<1x24x32xf32>,
      %cst_61 = arith.constant 0.000000e+00 : f32
      %99 = vector.broadcast %cst_61 : f32 to vector<4x32xf32>
      %c0_62 = arith.constant 0 : index
      %c0_63 = arith.constant 0 : index
      %100 = vector.load %arg13[%c0_62, %c0_63] : memref<4x32xf32, #tpu.memory_space<vmem>>, vector<4x32xf32>
      tpu.vector_store %arg13[%c0_62, %c0_63], %99 {strides = array<i32>} : memref<4x32xf32, #tpu.memory_space<vmem>>, vector<4x32xf32>,
    } else {
    }
    %c0_46 = arith.constant 0 : index
    %c0_47 = arith.constant 0 : index
    %c0_48 = arith.constant 0 : index
    %85 = vector.load %arg12[%c0_46, %c0_47, %c0_48] : memref<1x24x32xf32, #tpu.memory_space<vmem>>, vector<1x24x32xf32>
    %86 = vector.shape_cast %85 : vector<1x24x32xf32> to vector<24x32xf32>
    %87 = arith.addf %86, %80 : vector<24x32xf32>
    %c0_49 = arith.constant 0 : index
    %c0_50 = arith.constant 0 : index
    %c0_51 = arith.constant 0 : index
    %88 = vector.load %arg12[%c0_49, %c0_50, %c0_51] : memref<1x24x32xf32, #tpu.memory_space<vmem>>, vector<1x24x32xf32>
    %89 = vector.shape_cast %88 : vector<1x24x32xf32> to vector<24x32xf32>
    %90 = vector.shape_cast %87 : vector<24x32xf32> to vector<1x24x32xf32>
    tpu.vector_store %arg12[%c0_49, %c0_50, %c0_51], %90 {strides = array<i32>} : memref<1x24x32xf32, #tpu.memory_space<vmem>>, vector<1x24x32xf32>,
    %c0_52 = arith.constant 0 : index
    %c0_53 = arith.constant 0 : index
    %91 = vector.load %arg13[%c0_52, %c0_53] : memref<4x32xf32, #tpu.memory_space<vmem>>, vector<4x32xf32>
    %92 = arith.addf %91, %81 : vector<4x32xf32>
    %c0_54 = arith.constant 0 : index
    %c0_55 = arith.constant 0 : index
    %93 = vector.load %arg13[%c0_54, %c0_55] : memref<4x32xf32, #tpu.memory_space<vmem>>, vector<4x32xf32>
    tpu.vector_store %arg13[%c0_54, %c0_55], %92 {strides = array<i32>} : memref<4x32xf32, #tpu.memory_space<vmem>>, vector<4x32xf32>,
    %c3_i32 = arith.constant 3 : i32
    %94 = arith.cmpi eq, %arg1, %c3_i32 : i32
    %95 = arith.extui %94 : i1 to i32
    %c0_i32_56 = arith.constant 0 : i32
    %96 = arith.cmpi ne, %95, %c0_i32_56 : i32
    scf.if %96 {
      %c0_57 = arith.constant 0 : index
      %c0_58 = arith.constant 0 : index
      %97 = vector.load %arg13[%c0_57, %c0_58] : memref<4x32xf32, #tpu.memory_space<vmem>>, vector<4x32xf32>
      %c0_59 = arith.constant 0 : index
      %c0_60 = arith.constant 0 : index
      %c0_61 = arith.constant 0 : index
      %98 = vector.load %arg12[%c0_59, %c0_60, %c0_61] : memref<1x24x32xf32, #tpu.memory_space<vmem>>, vector<1x4x32xf32>
      %99 = vector.shape_cast %98 : vector<1x4x32xf32> to vector<4x32xf32>
      %100 = vector.shape_cast %97 : vector<4x32xf32> to vector<1x4x32xf32>
      tpu.vector_store %arg12[%c0_59, %c0_60, %c0_61], %100 {strides = array<i32>} : memref<1x24x32xf32, #tpu.memory_space<vmem>>, vector<1x4x32xf32>,
    } else {
    }
    return
  }
  func.func @transform_0(%arg0: i32, %arg1: i32) -> (i32, i32, i32) {
    %c0_i32 = arith.constant 0 : i32
    %c0_i32_0 = arith.constant 0 : i32
    %c0_i32_1 = arith.constant 0 : i32
    return %arg0, %c0_i32, %c0_i32_0 : i32, i32, i32
  }
  func.func @transform_1(%arg0: i32, %arg1: i32) -> (i32, i32, i32) {
    %c0_i32 = arith.constant 0 : i32
    %c0_i32_0 = arith.constant 0 : i32
    %c0_i32_1 = arith.constant 0 : i32
    return %arg1, %c0_i32, %c0_i32_0 : i32, i32, i32
  }
  func.func @transform_2(%arg0: i32, %arg1: i32) -> (i32, i32, i32) {
    %c0_i32 = arith.constant 0 : i32
    %c0_i32_0 = arith.constant 0 : i32
    %c0_i32_1 = arith.constant 0 : i32
    return %arg1, %c0_i32, %c0_i32_0 : i32, i32, i32
  }
  func.func @transform_3(%arg0: i32, %arg1: i32) -> (i32, i32, i32) {
    %c0_i32 = arith.constant 0 : i32
    %c0_i32_0 = arith.constant 0 : i32
    %c0_i32_1 = arith.constant 0 : i32
    return %arg1, %c0_i32, %c0_i32_0 : i32, i32, i32
  }
  func.func @transform_4(%arg0: i32, %arg1: i32) -> (i32, i32, i32) {
    %c0_i32 = arith.constant 0 : i32
    %c0_i32_0 = arith.constant 0 : i32
    %c0_i32_1 = arith.constant 0 : i32
    return %arg1, %c0_i32, %c0_i32_0 : i32, i32, i32
  }
  func.func @transform_5(%arg0: i32, %arg1: i32) -> (i32, i32, i32) {
    %c0_i32 = arith.constant 0 : i32
    %c0_i32_0 = arith.constant 0 : i32
    %c0_i32_1 = arith.constant 0 : i32
    return %arg1, %c0_i32, %c0_i32_0 : i32, i32, i32
  }
  func.func @transform_6(%arg0: i32, %arg1: i32) -> (i32, i32, i32) {
    %c0_i32 = arith.constant 0 : i32
    %c0_i32_0 = arith.constant 0 : i32
    %c0_i32_1 = arith.constant 0 : i32
    return %arg1, %c0_i32, %c0_i32_0 : i32, i32, i32
  }
  func.func @transform_7(%arg0: i32, %arg1: i32) -> (i32, i32, i32) {
    %c0_i32 = arith.constant 0 : i32
    %c0_i32_0 = arith.constant 0 : i32
    %c0_i32_1 = arith.constant 0 : i32
    return %arg0, %c0_i32, %c0_i32_0 : i32, i32, i32
  }
  func.func @transform_8(%arg0: i32, %arg1: i32) -> (i32, i32, i32) {
    %c0_i32 = arith.constant 0 : i32
    %c0_i32_0 = arith.constant 0 : i32
    %c0_i32_1 = arith.constant 0 : i32
    return %arg0, %c0_i32, %c0_i32_0 : i32, i32, i32
  }
  func.func @transform_9(%arg0: i32, %arg1: i32) -> (i32, i32, i32) {
    %c0_i32 = arith.constant 0 : i32
    %c0_i32_0 = arith.constant 0 : i32
    %c0_i32_1 = arith.constant 0 : i32
    return %arg1, %c0_i32, %c0_i32_0 : i32, i32, i32
  }
  func.func @transform_10(%arg0: i32, %arg1: i32) -> (i32, i32, i32) {
    %c0_i32 = arith.constant 0 : i32
    %c0_i32_0 = arith.constant 0 : i32
    %c0_i32_1 = arith.constant 0 : i32
    return %arg0, %c0_i32, %c0_i32_0 : i32, i32, i32
  }
}

</mosaic_0001>

<bundles_post_ra>
// kernel: t5_block_attention_forward.1
= control target key start
LH: loop header
LB: loop body
LE: loop exit
PB: predicated region body
PF: predicated region fallthrough
CT: control target
= control target key end

     0   :  { %s2524_s13 = smov 0   ;;  %s2526_s14 = smov 0   ;;  %s2804_s0 = inlined_call_operand.vmem [shape: f32[2,24,32], index: 0, kind: input, shape index: {}]   ;;  %s2805_s1 = inlined_call_operand.vmem [shape: f32[4,32,8], index: 1, kind: input, shape index: {}]   ;;  %s2806_s2 = inlined_call_operand.vmem [shape: f32[4,32,8], index: 2, kind: input, shape index: {}]   ;;  %s2807_s3 = inlined_call_operand.vmem [shape: f32[4,32,8], index: 3, kind: input, shape index: {}]   ;;  %s2808_s4 = inlined_call_operand.vmem [shape: f32[4,8,4], index: 4, kind: input, shape index: {}]   ;;  %s2809_s5 = inlined_call_operand.vmem [shape: f32[4,8,8], index: 5, kind: input, shape index: {}]   ;;  %s2810_s6 = inlined_call_operand.vmem [shape: f32[4,4,24], index: 6, kind: input, shape index: {}]   ;;  %s2811_s7 = inlined_call_operand.vmem [shape: f32[2,3,4], index: 7, kind: input, shape index: {}]   ;;  %s2812_s8 = inlined_call_operand.vmem [shape: f32[2,3,8], index: 8, kind: input, shape index: {}]   ;;  %s2813_s9 = inlined_call_operand.vmem [shape: f32[4,8,32], index: 9, kind: input, shape index: {}]   ;;  %s2814_s10 = inlined_call_operand.vmem [shape: f32[2,24,32], index: 10, kind: output, shape index: {}]  }
   0x1   :  { %2815 = sst [smem:[#allocation3_spill]] %s2804_s0  ;;  %s2528_s15 = smov 0  }
   0x2   :  { %s2530_s16 = smov 0   ;;  %s2532_s17 = smov 0  }
   0x3 LB: > { %s29_s18 = sadd.s32 1, %s2455_s15  ;;  %s32_s19 = sadd.s32 1, %s2459_s16  ;;  %s2463_s17 = sphi %s2532_s17, %s20_s17   ;;  %s2459_s16 = sphi %s2530_s16, %s2820_s16   ;;  %s2455_s15 = sphi %s2528_s15, %s2819_s15   ;;  %s2451_s14 = sphi %s2526_s14, %s2818_s14   ;;  %s2447_s13 = sphi %s2524_s13, %s2817_s13  }
   0x4   : > { %p30_p0 = scmp.ge.s32.totalorder %s29_s18, 4  ;;  %p2107_p1 = scmp.ge.s32.totalorder %s2463_s17, 1 }
   0x5   : > { %p408_p2 = scmp.lt.s32.totalorder %s2463_s17, 9 }
   0x6   : > { %s2822_s18 = smov (%p30_p0, %s29_s18), 0  ;;  %s2824_s19 = smov (!%p30_p0, %s32_s19), %s2459_s16 }
   0x7   : > { %p409_p3 = pnand %p2107_p1, %p408_p2  ;;  %p34_p4 = scmp.ge.s32.totalorder %s2824_s19, 2 }
   0x8   : > { %p490_p5 = scmp.lt.s32.totalorder (!%p409_p3), %s2447_s13, 3  ;;  %p485_p6 = scmp.lt.s32.totalorder (!%p409_p3), %s2451_s14, 1 }
   0x9   : > { %s2826_s19 = smov (%p34_p4, %s2824_s19), 0  ;;  %412 = sbr.rel (%p409_p3) target bundleno = 1362 (0x552), region = 60 }
   0xa   : > { %s2816_s0 = sld [smem:[#allocation3_spill]] (!%p409_p3)  ;;  %p2159_p7 = scmp.ne.s32.totalorder (!%p409_p3), %s2447_s13, 0 }
   0xe   : > { %v2465_v0 = vmov 0.0   ;;  %s2560_s20 = scalar_select %p490_p5, %s2447_s13, 3  ;;  %vm2466_vm0 = vmmov 0   ;;  %vm555_vm1 = vcmask 261120   ;;  %vm805_vm2 = vcmask 64512  }
   0xf   : > { %2238 = vmatprep.subr.mxu1 %v2465_v0  ;;  %2221 = vmatprep.subr.mxu0 %v2465_v0  ;;  %s2828_s14 = smov (!%p485_p6, %s2451_s14), 1  ;;  %vm1271_vm3 = vcmask 1043456   ;;  %v2467_v34 = vmov 1966171168   ;;  %v913_v36 = vlaneseq  ;;  %vm1201_vm4 = vcmask 31744  }
  0x10   : > { %2246 = vmatprep.mubr.msk.f32.mxu1 %vm2466_vm0, %v2465_v0  ;;  %2229 = vmatprep.mubr.msk.f32.mxu0 %vm2466_vm0, %v2465_v0  ;;  %s2163_s21 = sshll.u32 %s2560_s20, 5  ;;  %s2358_s28 = smul.u32 24, %s2828_s14  ;;  %v911_v35 = vunpack.c.l.s4 %v2467_v34  ;;  %vm1653_vm5 = vcmask 191488   ;;  %vm1660_vm6 = vcmask 195584  }
  0x11   : > { %s499_s24 = scalar_lea.vmem %s2806_s2, %s2163_s21  ;;  %s494_s27 = scalar_lea.vmem %s2805_s1, %s2163_s21  ;;  %v914_v38 = vshrl.u32 %v913_v36, 7 }
  0x12   : > { %v544_v1 = vld [vmem:[%s499_s24 + $0x18] sm:$0xff]  ;;  %v543_v2 = vld [vmem:[%s499_s24 + $0x10] sm:$0xff]  ;;  %v542_v5 = vld [vmem:[%s499_s24 + $0x8] sm:$0xff]  ;;  %s489_s11 = scalar_lea.vmem %s2816_s0, %s2358_s28  ;;  %s2584_s23 = scalar_lea.vmem %s2814_s10, %s2358_s28  ;;  %v912_v37 = vunpack.c.0.s8 %v911_v35 }
  0x13   : > { %v540_v3 = vld [vmem:[%s494_s27 + $0x18] sm:$0xff]  ;;  %2239 = vmatpush3.msra.mxu1 %v544_v1  ;;  %v539_v4 = vld [vmem:[%s494_s27 + $0x10] sm:$0xff]  ;;  %v538_v6 = vld [vmem:[%s494_s27 + $0x8] sm:$0xff]  ;;  %s504_s29 = scalar_lea.vmem %s2807_s3, %s2163_s21  ;;  %s2118_s21 = sshll.u32 %s2828_s14, 2  ;;  %v927_v43 = vsub.s32 0, %v914_v38 }
  0x14   : > { %2222 = vmatpush3.msra.mxu0 %v540_v3  ;;  %2240 = vmatprep.subr.mxu1 %v2465_v0  ;;  %v541_v7 = vld [vmem:[%s499_s24] sm:$0xff]  ;;  %v548_v10 = vld [vmem:[%s504_s29 + $0x18] sm:$0xff]  ;;  %v535_v11 = vld [vmem:[%s489_s11 + $0x8] sm:$0xff]  ;;  %s520_s28 = scalar_lea.vmem %s2811_s7, %s2118_s21  ;;  %v915_v39 = vsub.s32 %v912_v37, %v914_v38  ;;  %s524_s12 = scalar_lea.vmem %s2812_s8, %s2118_s21 }
  0x15   : > { %2223 = vmatprep.subr.mxu0 %v2465_v0  ;;  %2241 = vmatpush3.msra.mxu1 %v543_v2  ;;  %v537_v8 = vld [vmem:[%s494_s27] sm:$0xff]  ;;  %v547_v12 = vld [vmem:[%s504_s29 + $0x10] sm:$0xff]  ;;  %v546_v14 = vld [vmem:[%s504_s29 + $0x8] sm:$0xff]  ;;  %s2684_s22 = sshll.u32 %s2560_s20, 3  ;;  %s2117_s0 = sshll.u32 %s2560_s20, 2 }
  0x16   : > { %2224 = vmatpush3.msra.mxu0 %v539_v4  ;;  %2242 = vmatprep.subr.mxu1 %v2465_v0  ;;  %v534_v9 = vld [vmem:[%s489_s11] sm:$0xff]  ;;  %v536_v13 = vld [vmem:[%s489_s11 + $0x10] sm:$0xff]  ;;  %s508_s14 = scalar_lea.vmem %s2808_s4, %s2684_s22  ;;  %s512_s24 = scalar_lea.vmem %s2809_s5, %s2684_s22 }
  0x17   : > { %2225 = vmatprep.subr.mxu0 %v2465_v0  ;;  %2243 = vmatpush3.msra.mxu1 %v542_v5  ;;  %v545_v15 = vld [vmem:[%s504_s29] sm:$0xff]  ;;  %s528_s11 = scalar_lea.vmem %s2813_s9, %s2684_s22 }
  0x18   : > { %2226 = vmatpush3.msra.mxu0 %v538_v6  ;;  %2244 = vmatprep.subr.mxu1 %v2465_v0  ;;  %v2135_v40 = vld.sshfl [vmem:[%s520_s28] sm:$0x13 pattern:$0x75316420]  ;;  %s516_s28 = scalar_lea.vmem %s2810_s6, %s2117_s0 }
  0x19   : > { %2227 = vmatprep.subr.mxu0 %v2465_v0  ;;  %2245 = vmatpush3.msra.mxu1 %v541_v7  ;;  %v2142_v41 = vld.sshfl [vmem:[%s524_s12] sm:$0x13 pattern:$0x75316420]  ;;  %v916_v42 = vrot.slane %v2135_v40, %v915_v39  ;;  %v909_v44 = vcombine.high %v2135_v40, %v2135_v40 }
  0x1a   : > { %2228 = vmatpush3.msra.mxu0 %v537_v8  ;;  %2247 = vmatmul.mubr.msk.f32.vlgmr.msra.gmra.mxu1 %vm555_vm1, %v534_v9  ;;  %v1174_v45 = vrot.slane %v2142_v41, %v915_v39  ;;  %v550_v46 = vld [vmem:[%s508_s14] sm:$0xff]  ;;  %v1167_v59 = vcombine.high %v2142_v41, %v2142_v41 }
  0x1b   : > { %2230 = vmatmul.mubr.msk.f32.vlgmr.msra.gmra.mxu0 %vm555_vm1, %v534_v9  ;;  %2249 = vmatprep.mubr.msk.f32.mxu1 %vm2466_vm0, %v2465_v0  ;;  %v551_v47 = vld [vmem:[%s512_s24] sm:$0xff]  ;;  %v928_v48 = vrot.slane %v916_v42, %v927_v43  ;;  %v923_v49 = vrot.slane %v909_v44, %v915_v39  ;;  %v924_v60 = vcombine.high %v916_v42, %v916_v42 }
  0x1c   : > { %2232 = vmatprep.mubr.msk.f32.mxu0 %vm2466_vm0, %v2465_v0  ;;  %2255 = vmatprep.subr.mxu0 %v2465_v0  ;;  %v1186_v54 = vrot.slane %v1174_v45, %v927_v43  ;;  %v1181_v4 = vrot.slane %v1167_v59, %v915_v39 }
  0x1d   : > { %2272 = vmatprep.subr.mxu1 %v2465_v0  ;;  %2256 = vmatpush3.msra.mxu0 %v548_v10  ;;  %v932_v58 = vrot.slane %v923_v49, %v927_v43  ;;  %v936_v5 = vrot.slane %v924_v60, %v927_v43 }
  0x1e   : > { %2250 = vmatmul.mubr.msk.f32.gmra.mxu1 %vm555_vm1, %v535_v11  ;;  %2257 = vmatprep.subr.mxu0 %v2465_v0 }
  0x1f   : > { %2233 = vmatmul.mubr.msk.f32.gmra.mxu0 %vm555_vm1, %v535_v11  ;;  %2252 = vmatprep.mubr.msk.f32.mxu1 %vm2466_vm0, %v2465_v0 }
  0x20   : > { %2235 = vmatprep.mubr.msk.f32.mxu0 %vm2466_vm0, %v2465_v0  ;;  %2258 = vmatpush3.msra.mxu0 %v547_v12 }
  0x21   : > { %2259 = vmatprep.subr.mxu0 %v2465_v0 }
  0x22   : > { %2253 = vmatmul.mubr.msk.f32.gmra.mxu1 %vm555_vm1, %v536_v13  ;;  %2260 = vmatpush3.msra.mxu0 %v546_v14  ;;  %v1190_v14 = vrot.slane %v1181_v4, %v927_v43 }
  0x23   : > { %2236 = vmatmul.mubr.msk.f32.gmra.mxu0 %vm555_vm1, %v536_v13  ;;  %2274 = vmatprep.mubr.msk.f32.mxu1 %vm2466_vm0, %v2465_v0 }
  0x24   : > { %2263 = vmatprep.mubr.msk.f32.mxu0 %vm2466_vm0, %v2465_v0  ;;  %2261 = vmatprep.subr.mxu0 %v2465_v0 }
  0x25   : > { %2262 = vmatpush3.msra.mxu0 %v545_v15 }
  0x26   : > { %2283 = vmatprep.subr.mxu0 %v2465_v0 }
  0x27   : > { %2264 = vmatmul.mubr.msk.f32.vlgmr.msra.gmra.mxu0 %vm555_vm1, %v534_v9 }
  0x28   : > { %2266 = vmatprep.mubr.msk.f32.mxu0 %vm2466_vm0, %v2465_v0 }
  0x2b   : > { %2267 = vmatmul.mubr.msk.f32.gmra.mxu0 %vm555_vm1, %v535_v11  ;;  %v1182_v11 = vcombine.high %v1174_v45, %v1174_v45 }
  0x2c   : > { %2269 = vmatprep.mubr.msk.f32.mxu0 %vm2466_vm0, %v2465_v0 }
  0x2f   : > { %2270 = vmatmul.mubr.msk.f32.gmra.mxu0 %vm555_vm1, %v536_v13 }
  0x30   : > { %2285 = vmatprep.mubr.msk.f32.mxu0 %vm2466_vm0, %v2465_v0 }
  0xda   : > { %v2626_v16 = vpop.f32.mrf.mxu1 }
  0xdb   : > { %v2628_v17 = vpop.f32.mrf.mxu0  ;;  %2273 = vmatpush3.xpose.msk.msra.mxu1 %vm805_vm2, %v2626_v16  ;;  %2284 = vmatpush3.xpose.msk.msra.mxu0 %vm805_vm2, %v2626_v16 }
  0xdc   : > { %v2248_v18 = vpop.f32.mrf.mxu1  ;;  %2288 = vmatprep.subr.mxu1 %v2465_v0  ;;  %2293 = vmatprep.subr.mxu0 %v2465_v0 }
  0xdd   : > { %v2231_v19 = vpop.f32.mrf.mxu0 }
  0xde   : > { %2275 = vmatmul.mubr.msk.f32.vlgmr.msra.gmra.mxu1 %vm805_vm2, %v2628_v17  ;;  %2286 = vmatmul.mubr.msk.f32.vlgmr.msra.gmra.mxu0 %vm805_vm2, %v2628_v17  ;;  %v2640_v21 = vpop.f32.mrf.mxu1 }
  0xdf   : > { %v636_v20 = vpop.f32.mrf.mxu0  ;;  %2277 = vmatprep.mubr.msk.f32.mxu1 %vm2466_vm0, %v2465_v0  ;;  %2289 = vmatpush3.xpose.msk.msra.mxu1 %vm805_vm2, %v2640_v21 }
  0xe0   : > { %v2251_v23 = vpop.f32.mrf.mxu1  ;;  %2295 = vmatprep.mubr.msk.f32.mxu0 %vm2466_vm0, %v2465_v0  ;;  %2298 = vmatprep.subr.mxu1 %v2465_v0 }
  0xe1   : > { %v2234_v22 = vpop.f32.mrf.mxu0  ;;  %v1194_v23 = vrot.slane %v1182_v11, %v927_v43 }
  0xe2   : > { %2278 = vmatmul.mubr.msk.f32.gmra.mxu1 %vm805_vm2, %v636_v20  ;;  %v2650_v25 = vpop.f32.mrf.mxu1 }
  0xe3   : > { %v641_v24 = vpop.f32.mrf.mxu0  ;;  %2280 = vmatprep.mubr.msk.f32.mxu1 %vm2466_vm0, %v2465_v0  ;;  %2294 = vmatpush3.xpose.msk.msra.mxu0 %vm805_vm2, %v2650_v25 }
  0xe4   : > { %v2254_v27 = vpop.f32.mrf.mxu1  ;;  %2309 = vmatprep.subr.mxu0 %v2465_v0 }
  0xe5   : > { %v2237_v26 = vpop.f32.mrf.mxu0 }
  0xe6   : > { %2281 = vmatmul.mubr.msk.f32.gmra.mxu1 %vm805_vm2, %v641_v24  ;;  %2296 = vmatmul.mubr.msk.f32.vlgmr.msra.gmra.mxu0 %vm805_vm2, %v641_v24 }
  0xe7   : > { %2290 = vmatprep.mubr.msk.f32.mxu1 %vm2466_vm0, %v2465_v0  ;;  %v2661_v28 = vpop.f32.mrf.mxu0  ;;  %2311 = vmatprep.mubr.msk.f32.mxu0 %vm2466_vm0, %v2465_v0 }
  0xe8   : > { %2310 = vmatpush3.msra.mxu0 %v2661_v28 }
  0xe9   : > { %v2265_v29 = vpop.f32.mrf.mxu0  ;;  %2314 = vmatprep.subr.mxu0 %v2465_v0 }
  0xea   : > { %2291 = vmatmul.mubr.msk.f32.vlgmr.msra.gmra.mxu1 %vm805_vm2, %v636_v20 }
  0xeb   : > { %v2668_v30 = vpop.f32.mrf.mxu0  ;;  %2300 = vmatprep.mubr.msk.f32.mxu1 %vm2466_vm0, %v2465_v0  ;;  %2299 = vmatpush3.msk.msra.mxu1 %vm1271_vm3, %v2661_v28 }
  0xec   : > { %2324 = vmatprep.subr.mxu1 %v2465_v0 }
  0xed   : > { %v2268_v31 = vpop.f32.mrf.mxu0 }
  0xef   : > { %v2672_v32 = vpop.f32.mrf.mxu0 }
  0xf1   : > { %v2271_v33 = vpop.f32.mrf.mxu0 }
 0x19e   : > { %v884_v50 = vpop.f32.mrf.mxu1  ;;  %v1009_v51 = vpop.f32.mrf.mxu0 }
 0x19f   : > { %v898_v52 = vadd.f32 %v884_v50, %v550_v46  ;;  %v1010_v53 = vadd.f32 %v1009_v51, %v551_v47 }
 0x1a0   : > { %v2276_v55 = vpop.f32.mrf.mxu1  ;;  %v2287_v56 = vpop.f32.mrf.mxu0 }
 0x1a1   : > { %v940_v57 = vadd.f32 %v928_v48, %v898_v52  ;;  %v1198_v1 = vadd.f32 %v1186_v54, %v1010_v53 }
 0x1a2   : > { %v889_v61 = vpop.f32.mrf.mxu1 }
 0x1a3   : > { %v899_v62 = vadd.f32 %v889_v61, %v550_v46  ;;  %v1202_v63 = vsel %vm1201_vm4, %v940_v57, -inf  ;;  %v1211_v9 = vsel %vm805_vm2, %v1198_v1, -inf }
 0x1a4   : > { %1203 = vmax.xlane.f32.xlu0 %v1202_v63  ;;  %v2279_v2 = vpop.f32.mrf.mxu1 }
 0x1a5   : > { %v941_v3 = vadd.f32 %v932_v58, %v899_v62 }
 0x1a6   : > { %v894_v6 = vpop.f32.mrf.mxu1  ;;  %v1155_v7 = vpop.f32.mrf.mxu0 }
 0x1a7   : > { %v900_v8 = vadd.f32 %v894_v6, %v550_v46  ;;  %v1205_v10 = vsel %vm1201_vm4, %v941_v3, -inf  ;;  %v1156_v20 = vadd.f32 %v1155_v7, %v551_v47  ;;  %v552_v7 = vld [vmem:[%s516_s28] sm:$0xf] }
 0x1a8   : > { %v2282_v12 = vpop.f32.mrf.mxu1  ;;  %1212 = vmax.xlane.f32.xlu0 %v1211_v9  ;;  %1206 = vmax.xlane.f32.xlu1 %v1205_v10  ;;  %v2297_v13 = vpop.f32.mrf.mxu0 }
 0x1a9   : > { %v942_v15 = vadd.f32 %v936_v5, %v900_v8  ;;  %v1200_v29 = vadd.f32 %v1194_v23, %v1156_v20 }
 0x1aa   : > { %v1082_v18 = vpop.f32.mrf.mxu1 }
 0x1ab   : > { %v1083_v19 = vadd.f32 %v1082_v18, %v551_v47  ;;  %v1208_v22 = vsel %vm1201_vm4, %v942_v15, -inf  ;;  %v1217_v31 = vsel %vm805_vm2, %v1200_v29, -inf  ;;  %v549_v18 = vld [vmem:[%s528_s11] sm:$0xff] }
 0x1ac   : > { %v2292_v24 = vpop.f32.mrf.mxu1  ;;  %1209 = vmax.xlane.f32.xlu0 %v1208_v22 }
 0x1ad   : > { %v1199_v26 = vadd.f32 %v1190_v14, %v1083_v19 }
 0x1af   : > { %v1214_v27 = vsel %vm805_vm2, %v1199_v26, -inf }
 0x1b0   : > { %1215 = vmax.xlane.f32.xlu1 %v1214_v27 }
 0x1b4   : > { %1218 = vmax.xlane.f32.xlu1 %v1217_v31 }
 0x22d   : > { %v1204_v33 = vpop.xlane.xlu0 %1203 }
 0x231   : > { %v1213_v34 = vpop.xlane.xlu0 %1212  ;;  %v1207_v38 = vpop.xlane.xlu1 %1206 }
 0x232   : > { %v1220_v35 = vmax.f32 %v1204_v33, %v1213_v34 }
 0x234   : > { %v1223_v36 = vsub.f32 %v940_v57, %v1220_v35  ;;  %v1232_v37 = vsub.f32 %v1198_v1, %v1220_v35 }
 0x235   : > { %v1210_v45 = vpop.xlane.xlu0 %1209 }
 0x236   : > { %v1226_v39 = vmul.f32 1.442695, %v1223_v36  ;;  %v1235_v40 = vmul.f32 1.442695, %v1232_v37 }
 0x238   : > { %2403 = vpow2.f32 %v1226_v39 }
 0x239   : > { %2405 = vpow2.f32 %v1235_v40  ;;  %v1216_v41 = vpop.xlane.xlu1 %1215 }
 0x23a   : > { %v1221_v42 = vmax.f32 %v1207_v38, %v1216_v41 }
 0x23c   : > { %v1224_v43 = vsub.f32 %v941_v3, %v1221_v42  ;;  %v1233_v44 = vsub.f32 %v1199_v26, %v1221_v42 }
 0x23d   : > { %v1219_v46 = vpop.xlane.xlu1 %1218 }
 0x23e   : > { %v1228_v47 = vmul.f32 1.442695, %v1224_v43  ;;  %v1237_v48 = vmul.f32 1.442695, %v1233_v44  ;;  %v1222_v49 = vmax.f32 %v1210_v45, %v1219_v46 }
 0x240   : > { %2407 = vpow2.f32 %v1228_v47  ;;  %v1225_v50 = vsub.f32 %v942_v15, %v1222_v49  ;;  %v1234_v51 = vsub.f32 %v1200_v29, %v1222_v49 }
 0x241   : > { %2409 = vpow2.f32 %v1237_v48 }
 0x242   : > { %v1230_v52 = vmul.f32 1.442695, %v1225_v50  ;;  %v1239_v53 = vmul.f32 1.442695, %v1234_v51 }
 0x244   : > { %2411 = vpow2.f32 %v1230_v52 }
 0x245   : > { %v2404_v54 = vpop.eup %2403  ;;  %2413 = vpow2.f32 %v1239_v53 }
 0x246   : > { %v2700_v55 = vpop.eup %2405  ;;  %2301 = vmatmul.mubr.msk.f32.vlgmr.msra.gmra.mxu1 %vm1201_vm4, %v2404_v54  ;;  %v1241_v56 = vsel %vm1201_vm4, %v2404_v54, 0.0 }
 0x247   : > { %2312 = vmatmul.mubr.msk.f32.vlgmr.msra.gmra.mxu0 %vm805_vm2, %v2700_v55  ;;  %2325 = vmatpush3.xpose.msk.msra.mxu1 %vm805_vm2, %v2650_v25  ;;  %v1250_v13 = vsel %vm805_vm2, %v2700_v55, 0.0 }
 0x248   : > { %2315 = vmatpush3.msra.mxu0 %v2668_v30  ;;  %1242 = vadd.xlane.f32.xlu1 %v1241_v56 }
 0x249   : > { %2326 = vmatprep.subr.mxu1 %v2465_v0  ;;  %2303 = vmatprep.mubr.msk.f32.mxu1 %vm2466_vm0, %v2465_v0 }
 0x24a   : > { %2316 = vmatprep.mubr.msk.f32.mxu0 %vm2466_vm0, %v2465_v0  ;;  %2319 = vmatprep.subr.mxu0 %v2465_v0 }
 0x24b   : > { %2327 = vmatpush3.xpose.msk.msra.mxu1 %vm805_vm2, %v2640_v21 }
 0x24c   : > { %2328 = vmatprep.subr.mxu1 %v2465_v0 }
 0x24d   : > { %v2408_v57 = vpop.eup %2407 }
 0x24e   : > { %v2410_v25 = vpop.eup %2409  ;;  %2304 = vmatmul.mubr.msk.f32.gmra.mxu1 %vm1201_vm4, %v2408_v57  ;;  %v1244_v58 = vsel %vm1201_vm4, %v2408_v57, 0.0 }
 0x24f   : > { %2317 = vmatmul.mubr.msk.f32.vlgmr.msra.gmra.mxu0 %vm805_vm2, %v2410_v25  ;;  %2329 = vmatpush3.xpose.msk.msra.mxu1 %vm805_vm2, %v2626_v16  ;;  %v1253_v14 = vsel %vm805_vm2, %v2410_v25, 0.0 }
 0x250   : > { %2320 = vmatpush3.msra.mxu0 %v2672_v32  ;;  %1245 = vadd.xlane.f32.xlu1 %v1244_v58 }
 0x251   : > { %v2412_v59 = vpop.eup %2411  ;;  %2306 = vmatprep.mubr.msk.f32.mxu1 %vm2466_vm0, %v2465_v0  ;;  %2321 = vmatprep.mubr.msk.f32.mxu0 %vm2466_vm0, %v2465_v0 }
 0x252   : > { %v2414_v21 = vpop.eup %2413  ;;  %2333 = vmatprep.subr.mxu0 %v2465_v0  ;;  %2307 = vmatmul.mubr.msk.f32.gmra.mxu1 %vm1201_vm4, %v2412_v59  ;;  %v1247_v60 = vsel %vm1201_vm4, %v2412_v59, 0.0 }
 0x253   : > { %2322 = vmatmul.mubr.msk.f32.vlgmr.msra.gmra.mxu0 %vm805_vm2, %v2414_v21  ;;  %2330 = vmatprep.mubr.msk.f32.mxu1 %vm2466_vm0, %v2465_v0  ;;  %v1256_v15 = vsel %vm805_vm2, %v2414_v21, 0.0 }
 0x254   : > { %2334 = vmatpush3.msra.mxu0 %v2672_v32  ;;  %1248 = vadd.xlane.f32.xlu1 %v1247_v60 }
 0x255   : > { %2335 = vmatprep.subr.mxu0 %v2465_v0  ;;  %2339 = vmatprep.mubr.msk.f32.mxu0 %vm2466_vm0, %v2465_v0 }
 0x256   : > { %2336 = vmatpush3.msra.mxu0 %v2668_v30  ;;  %2331 = vmatmul.mubr.msk.f32.vlgmr.msra.gmra.mxu1 %vm805_vm2, %v2628_v17 }
 0x257   : > { %2337 = vmatprep.subr.mxu0 %v2465_v0  ;;  %2342 = vmatprep.subr.mxu1 %v2465_v0 }
 0x258   : > { %2338 = vmatpush3.msra.mxu0 %v2661_v28  ;;  %2344 = vmatprep.mubr.msk.f32.mxu1 %vm2466_vm0, %v2465_v0 }
 0x259   : > { %2353 = vmatprep.subr.mxu0 %v2465_v0  ;;  %2343 = vmatpush3.msra.mxu1 %v549_v18 }
 0x2d1   : > { %v1243_v22 = vpop.xlane.xlu1 %1242 }
 0x2d9   : > { %v1246_v27 = vpop.xlane.xlu1 %1245 }
 0x2dd   : > { %v1249_v33 = vpop.xlane.xlu1 %1248 }
 0x306   : > { %v1341_v16 = vpop.f32.mrf.mxu1 }
 0x307   : > { %v1424_v32 = vpop.f32.mrf.mxu0 }
 0x308   : > { %v1574_v61 = vadd.f32 %v1424_v32, %v1341_v16  ;;  %v2302_v62 = vpop.f32.mrf.mxu1 }
 0x309   : > { %v2313_v63 = vpop.f32.mrf.mxu0 }
 0x30e   : > { %v1346_v30 = vpop.f32.mrf.mxu1 }
 0x30f   : > { %v1497_v1 = vpop.f32.mrf.mxu0 }
 0x310   : > { %v1575_v17 = vadd.f32 %v1497_v1, %v1346_v30  ;;  %v2305_v2 = vpop.f32.mrf.mxu1 }
 0x311   : > { %v2318_v3 = vpop.f32.mrf.mxu0 }
 0x312   : > { %v1351_v28 = vpop.f32.mrf.mxu1 }
 0x313   : > { %v1570_v4 = vpop.f32.mrf.mxu0 }
 0x314   : > { %v1576_v5 = vadd.f32 %v1570_v4, %v1351_v28  ;;  %v2308_v6 = vpop.f32.mrf.mxu1 }
 0x315   : > { %v2323_v8 = vpop.f32.mrf.mxu0 }
 0x316   : > { %v1649_v9 = vpop.f32.mrf.mxu1 }
 0x317   : > { %v1650_v10 = vadd.f32 %v1649_v9, %v552_v7 }
 0x318   : > { %v2332_v11 = vpop.f32.mrf.mxu1 }
 0x319   : > { %v1654_v12 = vsel %vm1653_vm5, %v1650_v10, -inf }
 0x31a   : > { %1655 = vmax.xlane.f32.xlu0 %v1654_v12 }
 0x31e   : > { %1251 = vadd.xlane.f32.xlu0 %v1250_v13 }
 0x322   : > { %1254 = vadd.xlane.f32.xlu0 %v1253_v14 }
 0x326   : > { %1257 = vadd.xlane.f32.xlu0 %v1256_v15 }
 0x3a3   : > { %v1656_v19 = vpop.xlane.xlu0 %1655 }
 0x3a4   : > { %v1657_v20 = vsub.f32 %v1650_v10, %v1656_v19 }
 0x3a6   : > { %v1658_v23 = vmul.f32 1.442695, %v1657_v20 }
 0x3a7   : > { %v1252_v24 = vpop.xlane.xlu0 %1251 }
 0x3a8   : > { %2415 = vpow2.f32 %v1658_v23  ;;  %v1259_v26 = vadd.f32 %v1252_v24, %v1243_v22 }
 0x3aa   : > { %2417 = vrcp.f32 %v1259_v26 }
 0x3ab   : > { %v1255_v29 = vpop.xlane.xlu0 %1254 }
 0x3ac   : > { %v1260_v31 = vadd.f32 %v1255_v29, %v1246_v27 }
 0x3ae   : > { %2419 = vrcp.f32 %v1260_v31 }
 0x3af   : > { %v1258_v34 = vpop.xlane.xlu0 %1257 }
 0x3b0   : > { %v1261_v35 = vadd.f32 %v1258_v34, %v1249_v33 }
 0x3b2   : > { %2421 = vrcp.f32 %v1261_v35 }
 0x3b5   : > { %v2416_v36 = vpop.eup %2415 }
 0x3b6   : > { %2340 = vmatmul.mubr.msk.f32.vlgmr.msra.gmra.mxu0 %vm1660_vm6, %v2416_v36  ;;  %v1734_v37 = vsel %vm1653_vm5, %v2416_v36, 0.0 }
 0x3b7   : > { %v2418_v38 = vpop.eup %2417  ;;  %1735 = vadd.xlane.f32.xlu1 %v1734_v37  ;;  %2354 = vmatpush3.msra.mxu0 %v549_v18 }
 0x3b8   : > { %v1578_v39 = vmul.f32 %v2418_v38, %v1574_v61  ;;  %2355 = vmatprep.mubr.msk.f32.mxu0 %vm2466_vm0, %v2465_v0 }
 0x3ba   : > { %2345 = vmatmul.mubr.msk.f32.vlgmr.msra.gmra.mxu1 %vm805_vm2, %v1578_v39 }
 0x3bb   : > { %v2420_v40 = vpop.eup %2419  ;;  %2347 = vmatprep.mubr.msk.f32.mxu1 %vm2466_vm0, %v2465_v0 }
 0x3bc   : > { %v1580_v41 = vmul.f32 %v2420_v40, %v1575_v17 }
 0x3be   : > { %2348 = vmatmul.mubr.msk.f32.gmra.mxu1 %vm805_vm2, %v1580_v41 }
 0x3bf   : > { %v2422_v42 = vpop.eup %2421  ;;  %2350 = vmatprep.mubr.msk.f32.mxu1 %vm2466_vm0, %v2465_v0 }
 0x3c0   : > { %v1582_v43 = vmul.f32 %v2422_v42, %v1576_v5 }
 0x3c2   : > { %2351 = vmatmul.mubr.msk.f32.gmra.mxu1 %vm805_vm2, %v1582_v43 }
 0x440   : > { %v1736_v44 = vpop.xlane.xlu1 %1735 }
 0x441   : > { %2423 = vrcp.f32 %v1736_v44 }
 0x44e   : > { %v2424_v45 = vpop.eup %2423 }
 0x476   : > { %v1730_v46 = vpop.f32.mrf.mxu0 }
 0x477   : > { %v1738_v47 = vmul.f32 %v2424_v45, %v1730_v46 }
 0x478   : > { %v2341_v48 = vpop.f32.mrf.mxu0 }
 0x479   : > { %2356 = vmatmul.mubr.msk.f32.vlgmr.msra.gmra.mxu0 %vm805_vm2, %v1738_v47 }
 0x47a   : > { %v1814_v49 = vpop.f32.mrf.mxu1 }
 0x47c   : > { %v2346_v50 = vpop.f32.mrf.mxu1 }
 0x47e   : > { %v1819_v51 = vpop.f32.mrf.mxu1 }
 0x480   : > { %v2349_v52 = vpop.f32.mrf.mxu1 }
 0x482   : > { %v1824_v53 = vpop.f32.mrf.mxu1 }
 0x484   : > { %v2352_v54 = vpop.f32.mrf.mxu1 }
 0x537   : > { %1904 = sbr.rel (%p2159_p7) target bundleno = 1344 (0x540), region = 64 }
 0x539   : > { %v1897_v55 = vpop.f32.mrf.mxu0 }
 0x53b   : > { %v2357_v56 = vpop.f32.mrf.mxu0 }
 0x53c   : > { %vm1908_vm7 = vcmask 257024   ;;  %v2468_v0 = vmov 0.0  }
 0x53d   : > { %1905 = vst.msk [vmem:[%s2584_s23] sm:$0xff] %vm555_vm1, %v2468_v0  ;;  %1906 = vst.msk [vmem:[%s2584_s23 + $0x8] sm:$0xff] %vm555_vm1, %v2468_v0 }
 0x53e   : > { %1907 = vst.msk [vmem:[%s2584_s23 + $0x10] sm:$0xff] %vm555_vm1, %v2468_v0 }
 0x53f   : > { %1909 = vst.msk [vmem:[#allocation2] sm:$0xf] %vm1908_vm7, %v2468_v0 }
 0x540 PF: > { %vm1921_vm8 = vcmask 257024   ;;  %p2160_p8 = scmp.ne.s32.totalorder %s2447_s13, 3 }
 0x544   : > { %v1910_v57 = vld [vmem:[%s2584_s23] sm:$0xff]  ;;  %v1911_v25 = vld [vmem:[%s2584_s23 + $0x8] sm:$0xff] }
 0x545   : > { %v1912_v58 = vld [vmem:[%s2584_s23 + $0x10] sm:$0xff]  ;;  %v1913_v59 = vadd.f32 %v1910_v57, %v1814_v49  ;;  %v1914_v21 = vadd.f32 %v1911_v25, %v1819_v51  ;;  %1926 = sbr.rel (%p2160_p8) target bundleno = 1362 (0x552), region = 68 }
 0x546   : > { %v1915_v60 = vadd.f32 %v1912_v58, %v1824_v53  ;;  %v1919_v16 = vld [vmem:[#allocation2] sm:$0xf] }
 0x547   : > { %v1920_v32 = vadd.f32 %v1919_v16, %v1897_v55  ;;  %1916 = vst.msk [vmem:[%s2584_s23] sm:$0xff] %vm555_vm1, %v1913_v59  ;;  %1917 = vst.msk [vmem:[%s2584_s23 + $0x8] sm:$0xff] %vm555_vm1, %v1914_v21 }
 0x548   : > { %1918 = vst.msk [vmem:[%s2584_s23 + $0x10] sm:$0xff] %vm555_vm1, %v1915_v60 }
 0x549   : > { %1922 = vst.msk [vmem:[#allocation2] sm:$0xf] %vm1921_vm8, %v1920_v32 }
 0x550   : > { %v1927_v61 = vld [vmem:[#allocation2] sm:$0xf] }
 0x551   : > { %1928 = vst.msk [vmem:[%s2584_s23] sm:$0xf] %vm1921_vm8, %v1927_v61 }
 0x552 PF: > { %s20_s17 = sadd.s32 1, %s2463_s17   ;;  %s2817_s13 = smov %s2455_s15 }
 0x553   : > { %p17_p9 = scmp.ge.s32.totalorder %s20_s17, 10   ;;  %s2818_s14 = smov %s2459_s16 }
 0x554   : > { %s2819_s15 = smov %s2822_s18  ;;  %s2820_s16 = smov %s2826_s19 }
 0x555   :  { %19 = sbr.rel (!%p17_p9) target bundleno = 3 (0x3), region = 125 }

</bundles_post_ra>
